<compile_context>
chip_gen: v5e
topology: v5e:2x2
jax: 0.10.0
libtpu: 0.0.40
codegen_flags: <defaults>
</compile_context>

<pallas_src>
import functools

import jax
import jax.numpy as jnp
from jax.experimental import pallas as pl
from jax.experimental.pallas import tpu as pltpu


def _round_up(a, b):
    return (a + b - 1) // b * b


def _cdiv(a, b):
    return (a + b - 1) // b


# ----------------------------------------------------------------------------
# Pallas kernel 1: explicit on-device identity copy (torch `.to(d, copy=True)`)
#   Direct HBM->HBM DMA, a few chunks in flight for overlap, exact element
#   count (handles ragged / sub-32-bit arrays without pad or slice passes).
# ----------------------------------------------------------------------------
def _dma_chunk_plan(n, itemsize):
    nbytes = n * itemsize
    max_inflight = 8                  # DMA descriptors kept in flight
    min_chunk_bytes = 512 * 1024      # don't shred small arrays into tiny DMAs
    nchunks = min(max_inflight, max(1, nbytes // min_chunk_bytes))
    chunk = _cdiv(n, nchunks)
    nchunks = _cdiv(n, chunk)         # drop empty trailing chunks
    return nchunks, chunk


def _make_hbm_copy_kernel(n, nchunks, chunk):
    # TODO(synk): on v7x, the chunk list could be split across the 2
    # TensorCores via pl.core_map(pltpu.create_tensorcore_mesh(...)) for
    # higher DMA-issue parallelism; single-core issue is sufficient here.
    def kernel(x_ref, o_ref, sems):
        copies = []
        for c in range(nchunks):      # static unroll over a handful of chunks
            start = c * chunk
            size = min(chunk, n - start)
            cp = pltpu.make_async_copy(
                x_ref.at[pl.ds(start, size)],
                o_ref.at[pl.ds(start, size)],
                sems.at[c],
            )
            cp.start()
            copies.append(cp)
        for cp in copies:             # drain only after all are in flight
            cp.wait()
    return kernel


@jax.jit
def _identity_copy(x):
    """Pallas HBM->HBM identity copy of an arbitrary array (exact, no padding)."""
    if x.size == 0:
        return x
    n = int(x.size)
    itemsize = jnp.dtype(x.dtype).itemsize
    nchunks, chunk = _dma_chunk_plan(n, itemsize)
    flat = x.reshape(-1)              # contiguous -> free layout change
    out = pl.pallas_call(
        _make_hbm_copy_kernel(n, nchunks, chunk),
        out_shape=jax.ShapeDtypeStruct((n,), x.dtype),
        in_specs=[pl.BlockSpec(memory_space=pl.ANY)],
        out_specs=pl.BlockSpec(memory_space=pl.ANY),
        scratch_shapes=[pltpu.SemaphoreType.DMA((nchunks,))],
    )(flat)
    return out.reshape(x.shape)


pallas_identity_copy = _identity_copy


def pallas_to_device(x, device, *, copy=False):
    """Equivalent of torch.Tensor.to(device[, copy=...]).

    * already on `device`  -> no-op (torch returns the same tensor); only an
      explicit copy=True triggers the Pallas HBM->HBM DMA copy.
    * on another device    -> a single jax.device_put transfer.  We do NOT run
      the Pallas copy on top of it — device_put already performs the full
      read + write, so adding a kernel would double the HBM traffic.
    """
    if not isinstance(x, jax.Array):
        return x
    try:
        on_target = device in x.devices()
    except Exception:  # uncommitted / abstract arrays: treat as on-device
        on_target = True
    if on_target:
        return _identity_copy(x) if copy else x
    # TODO(synk): batching many tiny pytree leaves into one fused transfer is
    # left to the caller; device_put already moves each leaf exactly once.
    return jax.device_put(x, device)


# ----------------------------------------------------------------------------
# Pallas kernel 2: demo wrapped module (flatten + linear), K-tiled MXU matmul
# ----------------------------------------------------------------------------
def _linear_kernel(x_ref, w_ref, b_ref, o_ref, acc_ref):
    k = pl.program_id(2)

    @pl.when(k == 0)
    def _init():
        acc_ref[...] = jnp.zeros_like(acc_ref)

    # Activation cast (f32 -> param dtype) fused into the kernel: the VPU cast
    # hides under the tile DMA / MXU work instead of a separate XLA pass.
    x = x_ref[...].astype(w_ref.dtype)
    acc_ref[...] += jnp.dot(x, w_ref[...], preferred_element_type=jnp.float32)

    @pl.when(k == pl.num_programs(2) - 1)
    def _finalize():
        # bias add + cast only once, not on every K step
        o_ref[...] = (acc_ref[...] + b_ref[...]).astype(o_ref.dtype)


def _pick_tile(dim, candidates):
    for c in candidates:
        if dim >= c and dim % c == 0:
            return c
    return dim  # full dim (allowed by the (8,128)-or-full rule)


def _linear_tiles(M, K, N, x_itemsize, w_itemsize):
    # 256/512-multiples keep v6e/v7x's 2x256x256 MXUs fully occupied and still
    # divide cleanly into v5e's 4x128x128 MXUs; fall back to 128s / full dim.
    tm = _pick_tile(M, (512, 256, 128, 8))
    tn = _pick_tile(N, (512, 256, 128))
    tk = _pick_tile(K, (512, 256, 128))

    def vmem_bytes(tm_, tn_, tk_):
        # double-buffered inputs + double-buffered output + f32 accumulator
        return (2 * (tm_ * tk_ * x_itemsize + tk_ * tn_ * w_itemsize + tn_ * 4)
                + 2 * tm_ * tn_ * 4 + tm_ * tn_ * 4)

    # Keep the working set under ~24 MiB so the same tiling fits v7x's 64 MiB
    # VMEM (32 MiB scoped default), not just v5e/v6e's 128 MiB.
    budget = 24 * 1024 * 1024
    while vmem_bytes(tm, tn, tk) > budget and tk > 128 and tk % 2 == 0:
        tk //= 2
    while vmem_bytes(tm, tn, tk) > budget and tn > 128 and tn % 2 == 0:
        tn //= 2
    return tm, tn, tk


@jax.jit
def _linear_forward(x2d, w, b):
    M, K = x2d.shape
    _, N = w.shape
    tm, tn, tk = _linear_tiles(M, K, N, x2d.dtype.itemsize, w.dtype.itemsize)
    grid = (M // tm, N // tn, K // tk)
    return pl.pallas_call(
        _linear_kernel,
        out_shape=jax.ShapeDtypeStruct((M, N), jnp.float32),
        grid_spec=pltpu.PrefetchScalarGridSpec(
            num_scalar_prefetch=0,
            grid=grid,
            in_specs=[
                pl.BlockSpec((tm, tk), lambda i, j, k: (i, k)),
                pl.BlockSpec((tk, tn), lambda i, j, k: (k, j)),
                pl.BlockSpec((1, tn), lambda i, j, k: (0, j)),
            ],
            out_specs=pl.BlockSpec((tm, tn), lambda i, j, k: (i, j)),
            scratch_shapes=[pltpu.VMEM((tm, tn), jnp.float32)],
        ),
        compiler_params=pltpu.CompilerParams(
            dimension_semantics=("parallel", "parallel", "arbitrary")),
    )(x2d, w, b)


class PallasLinearModule:
    """Stand-in for the user-provided `module` wrapped by FakeDataParallel."""

    def __init__(self, in_features, out_features, key, param_dtype=jnp.bfloat16):
        # param_dtype is explicit / configurable: FakeDataParallel itself never
        # changes dtypes; only this demo module chooses bf16 weights
        # (f32 MXU accumulation) for throughput.
        kw_, kb = jax.random.split(key)
        self.in_features = in_features
        self.out_features = out_features
        # pad N up to a lane-dense multiple of 128 so stores are unmasked vst
        self.n_pad = _round_up(out_features, 128)
        w = (jax.random.normal(kw_, (in_features, out_features), jnp.float32)
             * (1.0 / jnp.sqrt(in_features)))
        b = jax.random.normal(kb, (1, out_features), jnp.float32) * 0.01
        self.w_f32 = w                       # f32 reference copies
        self.b_f32 = b
        self.w = jnp.pad(
            w, ((0, 0), (0, self.n_pad - out_features))).astype(param_dtype)
        self.b = jnp.pad(b, ((0, 0), (0, self.n_pad - out_features)))  # f32

    def __call__(self, x, aux=None, **unused_kw):
        # Tolerates the extra structure / kwargs FakeDataParallel forwards.
        if isinstance(x, (list, tuple)):
            x = x[0]
        B = x.shape[0]
        xf = x.reshape(B, -1)                # stays f32; cast happens in-kernel
        out = _linear_forward(xf, self.w, self.b)
        return out[:, : self.out_features]


# ----------------------------------------------------------------------------
# FakeDataParallel: exact forward semantics of the PyTorch wrapper
# ----------------------------------------------------------------------------
class FakeDataParallel:
    def __init__(self, module, device_ids):
        print('FAKE DATA PARALLEL', device_ids)
        devs = jax.devices()
        self.device = devs[device_ids[0] % len(devs)]
        self.module = module

    def __call__(self, *args, **kw):
        d = self.device

        def map_obj(x):
            if isinstance(x, jax.Array):
                return pallas_to_device(x, d)
            elif isinstance(x, (tuple, list)):
                # PyTorch version returns a list for both tuple and list
                return list(map(map_obj, x))
            elif isinstance(x, dict):
                return {k: map_obj(v) for k, v in x.items()}
            else:
                return x

        return self.module(*map_obj(args), **map_obj(kw))


if __name__ == "__main__":
    key = jax.random.PRNGKey(0)
    kx, ky, kz, kmod = jax.random.split(key, 4)

    # small NCHW input consistent with a conv-style network input
    B, C, H, W = 2, 4, 16, 16
    x = jax.random.normal(kx, (B, C, H, W), jnp.float32)

    hidden = 32
    inner = PallasLinearModule(C * H * W, hidden, kmod)
    model = FakeDataParallel(inner, device_ids=[0])

    # plain tensor arg
    out = model(x)
    # list / dict / non-tensor leaves + kwargs all flow through map_obj
    out_nested = model([x, x], aux={"extra": x, "flag": 3}, unused_flag=True)

    jax.block_until_ready(out)
    jax.block_until_ready(out_nested)

    assert out.shape == (B, hidden)
    assert out_nested.shape == (B, hidden)
    assert jnp.allclose(out, out_nested)

    # wrapped linear vs f32 reference (bf16 weights, f32 accumulation)
    ref = x.reshape(B, -1) @ inner.w_f32 + inner.b_f32
    assert jnp.allclose(out, ref, rtol=5e-2, atol=5e-2)

    # explicit on-device copy (torch .to(device, copy=True)) exercises the
    # HBM->HBM DMA kernel; must be an exact identity.
    x_copy = pallas_to_device(x, model.device, copy=True)
    assert jnp.array_equal(x_copy, x)

    # ragged / sub-32-bit path: copied exactly, no pad or slice passes
    y = jax.random.normal(ky, (3, 5, 7), jnp.float32).astype(jnp.bfloat16)
    y_copy = pallas_identity_copy(y)
    assert jnp.array_equal(y_copy, y)

    # larger array: exercises the multi-chunk (overlapped DMA) path
    z = jax.random.normal(kz, (512, 1024), jnp.float32)   # 2 MiB -> 4 chunks
    z_copy = pallas_identity_copy(z)
    assert jnp.array_equal(z_copy, z)

    jax.block_until_ready((x_copy, y_copy, z_copy))
    print("KERNEL_OK")
</pallas_src>

<mosaic_0001>
module attributes {stable_mosaic.version = 11 : i64} {
  func.func @_linear_kernel(%arg0: i32, %arg1: i32, %arg2: i32, %arg3: memref<2x512xf32, #tpu.memory_space<vmem>>, %arg4: memref<512x128xbf16, #tpu.memory_space<vmem>>, %arg5: memref<1x128xf32, #tpu.memory_space<vmem>>, %arg6: memref<2x128xf32, #tpu.memory_space<vmem>>, %arg7: memref<2x128xf32, #tpu.memory_space<vmem>>) attributes {dimension_semantics = [#tpu.dimension_semantics<parallel>, #tpu.dimension_semantics<parallel>, #tpu.dimension_semantics<arbitrary>], iteration_bounds = array<i64: 1, 1, 2>, scalar_prefetch = 0 : i64, scratch_operands = 1 : i64, tpu.core_type = #tpu.core_type<tc>, window_params = [{transform_indices = @transform_0, window_bounds = array<i64: 2, 512>}, {transform_indices = @transform_1, window_bounds = array<i64: 512, 128>}, {transform_indices = @transform_2, window_bounds = array<i64: 1, 128>}, {transform_indices = @transform_3, window_bounds = array<i64: 2, 128>}]} {
    %c0_i32 = arith.constant 0 : i32
    %0 = arith.cmpi eq, %arg2, %c0_i32 : i32
    %1 = arith.extui %0 : i1 to i32
    %c0_i32_0 = arith.constant 0 : i32
    %2 = arith.cmpi ne, %1, %c0_i32_0 : i32
    scf.if %2 {
      %cst_9 = arith.constant 0.000000e+00 : f32
      %13 = vector.broadcast %cst_9 : f32 to vector<2x128xf32>
      %c0_10 = arith.constant 0 : index
      %c0_11 = arith.constant 0 : index
      %14 = vector.load %arg7[%c0_10, %c0_11] : memref<2x128xf32, #tpu.memory_space<vmem>>, vector<2x128xf32>
      tpu.vector_store %arg7[%c0_10, %c0_11], %13 {strides = array<i32>} : memref<2x128xf32, #tpu.memory_space<vmem>>, vector<2x128xf32>,
    } else {
    }
    %c0 = arith.constant 0 : index
    %c0_1 = arith.constant 0 : index
    %3 = vector.load %arg3[%c0, %c0_1] : memref<2x512xf32, #tpu.memory_space<vmem>>, vector<2x512xf32>
    %4 = arith.truncf %3 : vector<2x512xf32> to vector<2x512xbf16>
    %c0_2 = arith.constant 0 : index
    %c0_3 = arith.constant 0 : index
    %5 = vector.load %arg7[%c0_2, %c0_3] : memref<2x128xf32, #tpu.memory_space<vmem>>, vector<2x128xf32>
    %c0_4 = arith.constant 0 : index
    %c0_5 = arith.constant 0 : index
    %6 = vector.load %arg4[%c0_4, %c0_5] : memref<512x128xbf16, #tpu.memory_space<vmem>>, vector<512x128xbf16>
    %cst = arith.constant dense<0.000000e+00> : vector<2x128xf32>
    %7 = tpu.matmul %4, %6, %cst {dimension_numbers = #tpu.dot_dimension_numbers<[1], [0], [0], [1], [0, 0, 1, 1], [], []>} : vector<2x512xbf16>, vector<512x128xbf16>, vector<2x128xf32> -> vector<2x128xf32>
    %8 = arith.addf %5, %7 : vector<2x128xf32>
    %c0_6 = arith.constant 0 : index
    %c0_7 = arith.constant 0 : index
    %9 = vector.load %arg7[%c0_6, %c0_7] : memref<2x128xf32, #tpu.memory_space<vmem>>, vector<2x128xf32>
    tpu.vector_store %arg7[%c0_6, %c0_7], %8 {strides = array<i32>} : memref<2x128xf32, #tpu.memory_space<vmem>>, vector<2x128xf32>,
    %c1_i32 = arith.constant 1 : i32
    %10 = arith.cmpi eq, %arg2, %c1_i32 : i32
    %11 = arith.extui %10 : i1 to i32
    %c0_i32_8 = arith.constant 0 : i32
    %12 = arith.cmpi ne, %11, %c0_i32_8 : i32
    scf.if %12 {
      %c0_9 = arith.constant 0 : index
      %c0_10 = arith.constant 0 : index
      %13 = vector.load %arg7[%c0_9, %c0_10] : memref<2x128xf32, #tpu.memory_space<vmem>>, vector<2x128xf32>
      %c0_11 = arith.constant 0 : index
      %c0_12 = arith.constant 0 : index
      %14 = vector.load %arg5[%c0_11, %c0_12] : memref<1x128xf32, #tpu.memory_space<vmem>>, vector<1x128xf32>
      %15 = vector.broadcast %14 : vector<1x128xf32> to vector<2x128xf32>
      %16 = arith.addf %13, %15 : vector<2x128xf32>
      %c0_13 = arith.constant 0 : index
      %c0_14 = arith.constant 0 : index
      %17 = vector.load %arg6[%c0_13, %c0_14] : memref<2x128xf32, #tpu.memory_space<vmem>>, vector<2x128xf32>
      tpu.vector_store %arg6[%c0_13, %c0_14], %16 {strides = array<i32>} : memref<2x128xf32, #tpu.memory_space<vmem>>, vector<2x128xf32>,
    } else {
    }
    return
  }
  func.func @transform_0(%arg0: i32, %arg1: i32, %arg2: i32) -> (i32, i32) {
    %c0_i32 = arith.constant 0 : i32
    return %arg0, %arg2 : i32, i32
  }
  func.func @transform_1(%arg0: i32, %arg1: i32, %arg2: i32) -> (i32, i32) {
    %c0_i32 = arith.constant 0 : i32
    return %arg2, %arg1 : i32, i32
  }
  func.func @transform_2(%arg0: i32, %arg1: i32, %arg2: i32) -> (i32, i32) {
    %c0_i32 = arith.constant 0 : i32
    %c0_i32_0 = arith.constant 0 : i32
    return %c0_i32, %arg1 : i32, i32
  }
  func.func @transform_3(%arg0: i32, %arg1: i32, %arg2: i32) -> (i32, i32) {
    %c0_i32 = arith.constant 0 : i32
    return %arg0, %arg1 : i32, i32
  }
}

</mosaic_0001>

<bundles_post_ra>
// kernel: _linear_forward.1
= control target key start
LH: loop header
LB: loop body
LE: loop exit
PB: predicated region body
PF: predicated region fallthrough
CT: control target
= control target key end

     0   :  { %8 = vsyncpa [#allocation4], 0  ;;  %s1305_s0 = inlined_call_operand.hbm [shape: f32[2,1024], index: 0, kind: input, shape index: {}]   ;;  %s1306_s1 = inlined_call_operand.hbm [shape: bf16[1024,128], index: 1, kind: input, shape index: {}]   ;;  %s1307_s2 = inlined_call_operand.vmem [shape: f32[1,128], index: 2, kind: input, shape index: {}]   ;;  %s1308_s3 = inlined_call_operand.hbm [shape: f32[2,128], index: 3, kind: output, shape index: {}]  }
   0x1   :  { %10 = vsyncpa [#allocation4 + $0x1], 0 }
   0x2   :  { %11 = vsyncpa [#allocation7], 0 }
   0x3   :  { %13 = vsyncpa [#allocation7 + $0x1], 0 }
   0x4   :  { %14 = vsyncpa [#allocation5], 0  ;;  %s1151_s12 = smov 0   ;;  %s1153_s13 = smov 0  }
   0x5   :  { %s1155_s14 = smov 0   ;;  %s1157_s15 = smov 0  }
   0x6   :  { %s1159_s16 = smov 0   ;;  %s1161_s17 = smov 0  }
   0x7 LB: > { %s727_s18 = sadd.s32 4294967295, %s1125_s17   ;;  %s32_s19 = sadd.s32 1, %s1121_s16  ;;  %s1125_s17 = sphi %s1161_s17, %s20_s17   ;;  %s1121_s16 = sphi %s1159_s16, %s1316_s16   ;;  %s1117_s15 = sphi %s1157_s15, %s1315_s15   ;;  %s1113_s14 = sphi %s1155_s14, %s1314_s14   ;;  %s1109_s13 = sphi %s1153_s13, %s1313_s13   ;;  %s1105_s12 = sphi %s1151_s12, %s1312_s12  }
   0x8   : > { %p33_p0 = scmp.ge.s32.totalorder %s32_s19, 2  ;;  %s48_s20 = sadd.s32 1, %s1113_s14 }
   0x9   : > { %p55_p1 = scmp.ne.s32.totalorder %s1113_s14, %s1109_s13  ;;  %p56_p2 = scmp.eq.s32.totalorder %s1125_s17, 0 }
   0xa   : > { %s1318_s19 = smov (%p33_p0, %s32_s19), 0  ;;  %p61_p4 = scmp.ne.s32.totalorder %s1109_s13, %s1105_s12 }
   0xb   : > { %p1187_p3 = por %p56_p2, %p55_p1  ;;  %s44_s22 = ssub.s32 %s1121_s16, %s1318_s19 }
   0xc   : > { %p62_p5 = scmp.eq.s32.totalorder %s727_s18, 0  ;;  %p46_p6 = scmp.eq.s32.totalorder %s44_s22, 0 }
   0xd   : > { %p923_p8 = scmp.lt.s32.totalorder %s1125_s17, 2  ;;  %s1205_s25 = sand.u32 1, %s1113_s14  }
   0xe   : > { %p1196_p7 = por %p62_p5, %p61_p4  ;;  %s874_s26 = sshll.u32 %s1121_s16, 3 }
   0xf   : > { %s1202_s24 = scalar_select %p46_p6, %s1113_s14, %s48_s20  }
  0x10   : > { %s731_s27 = sshll.u32 %s1205_s25, 3  ;;  %s184_s30 = scalar_lea.hbm %s1305_s0, %s874_s26 }
  0x11   : > { %s186_s4 = sshll.u32 %s184_s30, 4  ;;  %s177_s5 = scalar_lea.vmem [#allocation3], %s731_s27  ;;  %s187_s4 = int_to_ptr.hbm [resolvable:$true] %s186_s4 }
  0x12   : > { %s188_s6 = sshll.u32 %s177_s5, 4  ;;  %p1214_p9 = pnand %p923_p8, %p1187_p3  ;;  %s189_s6 = int_to_ptr.vmem [resolvable:$true] %s188_s6 }
  0x13   : > { %p737_p10 = scmp.ge.s32.totalorder %s1125_s17, 1  ;;  %p216_p11 = scmp.lt.s32.totalorder %s1125_s17, 3 }
  0x14   : > { %s734_s8 = sshll.u32 %s1205_s25, 8  ;;  %s174_s9 = scalar_lea.sflag [#allocation4], %s1205_s25 }
  0x15   : > { %919 = dma.hbm_to_vmem [thread:$0]  (!%p1214_p9), %s187_s4, 128, %s189_s6, %s174_s9  }
  0x16   : > { %p217_p12 = pnand %p737_p10, %p216_p11  ;;  %s875_s10 = sshll.u32 %s1121_s16, 8 }
  0x17   : > { %s199_s11 = scalar_lea.vmem [#allocation6], %s734_s8  ;;  %s205_s21 = scalar_lea.hbm %s1306_s1, %s875_s10 }
  0x18   : > { %s208_s12 = sshll.u32 %s199_s11, 4  ;;  %s206_s26 = sshll.u32 %s205_s21, 4  ;;  %s209_s12 = int_to_ptr.vmem [resolvable:$true] %s208_s12  ;;  %s207_s26 = int_to_ptr.hbm [resolvable:$true] %s206_s26 }
  0x19   : > { %s196_s27 = scalar_lea.sflag [#allocation7], %s1205_s25  ;;  %s1127_s28 = smov 64  }
  0x1a   : > { %s1128_s29 = smov 4   ;;  %220 = sbr.rel (%p217_p12) target bundleno = 233 (0xe9), region = 32 }
  0x1b   : > { %922 = dma.hbm_to_vmem [thread:$0]  (!%p1214_p9), %s207_s26, 4096, %s209_s12, %s196_s27, %s1127_s28, %s1127_s28, %s1128_s29  }
  0x1c   : > { %s222_s30 = sand.u32 (!%p217_p12), 1, %s1109_s13  }
  0x1d   : > { %s738_s4 = sshll.u32 (!%p217_p12), %s222_s30, 3  ;;  %s223_s5 = scalar_lea.sflag (!%p217_p12), [#allocation4], %s222_s30 }
  0x1e   : > { %s1232_s6 = scalar_lea.vmem (!%p217_p12), [#allocation3], %s738_s4 }
  0x1f   : > { %1092 = dma.done.wait (%p1196_p7), %s223_s5, 128  }
  0x20   : > { %1094 = vsyncadd (%p1196_p7), %s223_s5, 4294967168  ;;  %s739_s8 = sshll.u32 %s222_s30, 8  ;;  %s233_s25 = scalar_lea.sflag [#allocation7], %s222_s30 }
  0x21   : > { %s1238_s9 = scalar_lea.vmem [#allocation6], %s739_s8 }
  0x22   : > { %1096 = dma.done.wait (%p1196_p7), %s233_s25, 4096  }
  0x23   : > { %1098 = vsyncadd (%p1196_p7), %s233_s25, 4294963200  ;;  %p740_p13 = scmp.ne.s32.totalorder %s1117_s15, 0 }
  0x25   : > { %271 = sbr.rel (%p740_p13) target bundleno = 44 (0x2c), region = 44 }
  0x2a   : > { %v1129_v0 = vmov 0.0  }
  0x2b   : > { %272 = vst [vmem:[#allocation2] sm:$0x3] %v1129_v0 }
  0x2c PF: > { %v883_v1 = vld [vmem:[%s1238_s9 + $0x38] sm:$0xff]  ;;  %v882_v5 = vld [vmem:[%s1238_s9 + $0x30] sm:$0xff]  ;;  %v881_v9 = vld [vmem:[%s1238_s9 + $0x28] sm:$0xff]  ;;  %p869_p0 = scmp.ne.s32.totalorder %s1117_s15, 1 }
  0x2d   : > { %v891_v2 = vld [vmem:[%s1238_s9 + $0x78] sm:$0xff]  ;;  %545 = vmatpush.bf16.msra.mxu0 %v883_v1  ;;  %v890_v6 = vld [vmem:[%s1238_s9 + $0x70] sm:$0xff]  ;;  %v889_v10 = vld [vmem:[%s1238_s9 + $0x68] sm:$0xff] }
  0x2e   : > { %v899_v3 = vld [vmem:[%s1238_s9 + $0xb8] sm:$0xff]  ;;  %558 = vmatpush.bf16.msra.mxu1 %v891_v2  ;;  %v898_v7 = vld [vmem:[%s1238_s9 + $0xb0] sm:$0xff]  ;;  %v897_v11 = vld [vmem:[%s1238_s9 + $0xa8] sm:$0xff] }
  0x2f   : > { %v907_v4 = vld [vmem:[%s1238_s9 + $0xf8] sm:$0xff]  ;;  %571 = vmatpush.bf16.msra.mxu2 %v899_v3  ;;  %v906_v8 = vld [vmem:[%s1238_s9 + $0xf0] sm:$0xff]  ;;  %v905_v12 = vld [vmem:[%s1238_s9 + $0xe8] sm:$0xff] }
  0x30   : > { %584 = vmatpush.bf16.msra.mxu3 %v907_v4  ;;  %v880_v13 = vld [vmem:[%s1238_s9 + $0x20] sm:$0xff]  ;;  %v273_v15 = vld [vmem:[%s1232_s6] sm:$0xff]  ;;  %v877_v26 = vld [vmem:[%s1238_s9 + $0x8] sm:$0xff] }
  0x31   : > { %546 = vmatpush.bf16.msra.mxu0 %v882_v5  ;;  %v888_v14 = vld [vmem:[%s1238_s9 + $0x60] sm:$0xff]  ;;  %275 = vst [vmem:[#allocation1] ss:$4 sm:$0xff] %v273_v15  ;;  %v879_v18 = vld [vmem:[%s1238_s9 + $0x18] sm:$0xff]  ;;  %v878_v22 = vld [vmem:[%s1238_s9 + $0x10] sm:$0xff] }
  0x32   : > { %559 = vmatpush.bf16.msra.mxu1 %v890_v6  ;;  %v896_v16 = vld [vmem:[%s1238_s9 + $0xa0] sm:$0xff]  ;;  %v887_v19 = vld [vmem:[%s1238_s9 + $0x58] sm:$0xff]  ;;  %v886_v23 = vld [vmem:[%s1238_s9 + $0x50] sm:$0xff] }
  0x33   : > { %572 = vmatpush.bf16.msra.mxu2 %v898_v7  ;;  %v904_v17 = vld [vmem:[%s1238_s9 + $0xe0] sm:$0xff]  ;;  %v895_v20 = vld [vmem:[%s1238_s9 + $0x98] sm:$0xff]  ;;  %v894_v24 = vld [vmem:[%s1238_s9 + $0x90] sm:$0xff] }
  0x34   : > { %585 = vmatpush.bf16.msra.mxu3 %v906_v8  ;;  %v903_v21 = vld [vmem:[%s1238_s9 + $0xd8] sm:$0xff]  ;;  %v902_v25 = vld [vmem:[%s1238_s9 + $0xd0] sm:$0xff]  ;;  %v885_v27 = vld [vmem:[%s1238_s9 + $0x48] sm:$0xff] }
  0x35   : > { %547 = vmatpush.bf16.msra.mxu0 %v881_v9  ;;  %v893_v28 = vld [vmem:[%s1238_s9 + $0x88] sm:$0xff]  ;;  %v876_v30 = vld [vmem:[%s1238_s9] sm:$0xff] }
  0x36   : > { %560 = vmatpush.bf16.msra.mxu1 %v889_v10  ;;  %v901_v29 = vld [vmem:[%s1238_s9 + $0xc8] sm:$0xff]  ;;  %v884_v31 = vld [vmem:[%s1238_s9 + $0x40] sm:$0xff] }
  0x37   : > { %573 = vmatpush.bf16.msra.mxu2 %v897_v11  ;;  %v892_v32 = vld [vmem:[%s1238_s9 + $0x80] sm:$0xff]  ;;  %v288_v50 = vld [vmem:[#allocation2] sm:$0x3] }
  0x38   : > { %586 = vmatpush.bf16.msra.mxu3 %v905_v12  ;;  %v900_v33 = vld [vmem:[%s1238_s9 + $0xc0] sm:$0xff]  ;;  %v277_v35 = vld.sshfl [vmem:[#allocation1 + $0x8] sm:$0xff pattern:$0x73625140] }
  0x39   : > { %548 = vmatpush.bf16.msra.mxu0 %v880_v13  ;;  %v276_v34 = vld.sshfl [vmem:[#allocation1] sm:$0xff pattern:$0x73625140]  ;;  %v278_v36 = vld.sshfl [vmem:[#allocation1 + $0x10] sm:$0xff pattern:$0x73625140]  ;;  %v285_v39 = vpack.c.bf16 %v277_v35, %v277_v35 }
  0x3a   : > { %561 = vmatpush.bf16.msra.mxu1 %v888_v14  ;;  %v279_v37 = vld.sshfl [vmem:[#allocation1 + $0x18] sm:$0xff pattern:$0x73625140]  ;;  %v284_v38 = vpack.c.bf16 %v276_v34, %v276_v34  ;;  %v286_v40 = vpack.c.bf16 %v278_v36, %v278_v36 }
  0x3b   : > { %574 = vmatpush.bf16.msra.mxu2 %v896_v16  ;;  %v287_v41 = vpack.c.bf16 %v279_v37, %v279_v37 }
  0x3c   : > { %587 = vmatpush.bf16.msra.mxu3 %v904_v17 }
  0x3d   : > { %549 = vmatpush.bf16.msra.mxu0 %v879_v18 }
  0x3e   : > { %562 = vmatpush.bf16.msra.mxu1 %v887_v19 }
  0x3f   : > { %575 = vmatpush.bf16.msra.mxu2 %v895_v20 }
  0x40   : > { %588 = vmatpush.bf16.msra.mxu3 %v903_v21 }
  0x41   : > { %550 = vmatpush.bf16.msra.mxu0 %v878_v22 }
  0x42   : > { %563 = vmatpush.bf16.msra.mxu1 %v886_v23 }
  0x43   : > { %576 = vmatpush.bf16.msra.mxu2 %v894_v24 }
  0x44   : > { %589 = vmatpush.bf16.msra.mxu3 %v902_v25 }
  0x45   : > { %551 = vmatpush.bf16.msra.mxu0 %v877_v26 }
  0x46   : > { %564 = vmatpush.bf16.msra.mxu1 %v885_v27 }
  0x47   : > { %577 = vmatpush.bf16.msra.mxu2 %v893_v28 }
  0x48   : > { %590 = vmatpush.bf16.msra.mxu3 %v901_v29 }
  0x49   : > { %552 = vmatpush.bf16.msra.mxu0 %v876_v30 }
  0x4a   : > { %565 = vmatpush.bf16.msra.mxu1 %v884_v31 }
  0x4b   : > { %578 = vmatpush.bf16.msra.mxu2 %v892_v32 }
  0x4c   : > { %591 = vmatpush.bf16.msra.mxu3 %v900_v33  ;;  %553 = vmatmul.bf16.vlgmr.msra.gmra.mxu0 %v284_v38 }
  0x4d   : > { %566 = vmatmul.bf16.vlgmr.msra.gmra.mxu1 %v285_v39 }
  0x4e   : > { %579 = vmatmul.bf16.vlgmr.msra.gmra.mxu2 %v286_v40 }
  0x4f   : > { %592 = vmatmul.bf16.vlgmr.msra.gmra.mxu3 %v287_v41 }
  0xc9   : > { %v554_v42 = vpop.f32.mrf.mxu0 }
  0xca   : > { %v567_v43 = vpop.f32.mrf.mxu1 }
  0xcb   : > { %v568_v44 = vadd.f32 %v567_v43, %v554_v42 }
  0xd1   : > { %v580_v45 = vpop.f32.mrf.mxu2  ;;  %v556_v48 = vpop.f32.mrf.mxu0 }
  0xd2   : > { %v593_v46 = vpop.f32.mrf.mxu3  ;;  %v581_v47 = vadd.f32 %v580_v45, %v568_v44  ;;  %v569_v49 = vpop.f32.mrf.mxu1 }
  0xd4   : > { %v594_v51 = vadd.f32 %v593_v46, %v581_v47 }
  0xd6   : > { %v597_v52 = vadd.f32 %v594_v51, %v288_v50  ;;  %602 = sbr.rel (%p869_p0) target bundleno = 227 (0xe3), region = 48 }
  0xd8   : > { %598 = vst [vmem:[#allocation2] sm:$0x3] %v597_v52 }
  0xd9   : > { %v582_v53 = vpop.f32.mrf.mxu2 }
  0xda   : > { %v595_v54 = vpop.f32.mrf.mxu3 }
  0xdb   : > { %v978_v56 = vld [vmem:[%s1307_s2] ss:$0 sm:$0xff] }
  0xdf   : > { %v603_v55 = vld [vmem:[#allocation2] sm:$0x3] }
  0xe0   : > { %v608_v57 = vadd.f32 %v978_v56, %v603_v55 }
  0xe2   : > { %609 = vst [vmem:[#allocation8] sm:$0x3] %v608_v57 }
  0xe3 PF: > { %p924_p1 = scmp.eq.s32.totalorder %s727_s18, 1  ;;  %s621_s12 = sshll.u32 %s1308_s3, 4  ;;  %s622_s12 = int_to_ptr.hbm [resolvable:$true] %s621_s12 }
  0xe4   : > { %s1130_s20 = smov [#allocation8]  }
  0xe5   : > { %s619_s22 = sshll.u32 %s1130_s20, 4  ;;  %s620_s22 = int_to_ptr.vmem [resolvable:$true] %s619_s22 }
  0xe6   : > { %913 = dma.vmem_to_hbm [thread:$0]  (%p924_p1), %s620_s22, 32, %s622_s12, [#allocation5]  }
  0xe7   : > { %1100 = dma.done.wait (%p924_p1), [#allocation5], 32  }
  0xe8   : > { %1102 = vsyncadd (%p924_p1), [#allocation5], 4294967264 }
  0xe9 PF: > { %s20_s17 = sadd.s32 1, %s1125_s17   ;;  %s1312_s12 = smov %s1109_s13 }
  0xea   : > { %p17_p2 = scmp.ge.s32.totalorder %s20_s17, 4   ;;  %s1313_s13 = smov %s1113_s14 }
  0xeb   : > { %s1314_s14 = smov %s1202_s24  ;;  %s1315_s15 = smov %s1121_s16 }
  0xec   : > { %s1316_s16 = smov %s1318_s19  ;;  %19 = sbr.rel (!%p17_p2) target bundleno = 7 (0x7), region = 94 }
  0xf1   :  { %635 = vsyncpa [#allocation4], 1 }
  0xf2   :  { %637 = vsyncpa [#allocation4 + $0x1], 1 }
  0xf3   :  { %638 = vsyncpa [#allocation7], 1 }
  0xf4   :  { %640 = vsyncpa [#allocation7 + $0x1], 1 }
  0xf5   :  { %641 = vsyncpa [#allocation5], 1 }
  0xf6   :  { %643 = vsyncpa [#allocation5 + $0x1], 1 }

</bundles_post_ra>
